<compile_context>
chip_gen: v7x
topology: tpu7x:2x2x1
jax: 0.10.0
libtpu: 0.0.40
codegen_flags: <defaults>
</compile_context>

<pallas_src>
import jax
import jax.numpy as jnp
from jax import lax
from jax.experimental import pallas as pl
from jax.experimental.pallas import tpu as pltpu


def _atloss_kernel(logits_ref, labels_ref, loss_ref):
    logits = logits_ref[...].astype(jnp.float32)   # (TB, C)
    labels = labels_ref[...].astype(jnp.float32)   # (TB, C), 0/1 (bf16 in HBM)

    col = lax.broadcasted_iota(jnp.int32, logits.shape, 1)
    is_col0 = col == 0

    # Functional form of the in-place writes: th_label[:, 0] = 1 ; labels[:, 0] = 0
    labels = jnp.where(is_col0, 0.0, labels)
    p_mask = jnp.where(is_col0, 1.0, labels)       # labels + th_label
    n_mask = 1.0 - labels                          # 1 where not a positive label

    # Single stabilized exp shared by both masked softmaxes. The unmasked row
    # max upper-bounds both masked subsets; masked terms are zeroed exactly by
    # the 0/1 masks (equivalent to the -1e30 trick, which flushes them to 0).
    m = jnp.max(logits, axis=-1, keepdims=True)    # (TB, 1)
    e = jnp.exp(logits - m)                        # (TB, C) — only exp in kernel

    sum1 = jnp.sum(e * p_mask, axis=-1, keepdims=True)   # always includes col 0
    sum2 = jnp.sum(e * n_mask, axis=-1, keepdims=True)   # always includes col 0
    lse1 = m + jnp.log(sum1)
    lse2 = m + jnp.log(sum2)

    num_pos = jnp.sum(labels, axis=-1, keepdims=True)            # (TB, 1)
    pdot = jnp.sum(p_mask * logits, axis=-1, keepdims=True)      # Σ labels·logits + logits[:,0]

    # loss1 + loss2 = num_pos*lse1 - Σ labels·logits  +  lse2 - logits[:, 0]
    loss_ref[...] = (num_pos * lse1 + lse2 - pdot).astype(loss_ref.dtype)


def _pick_tile_b(B, C):
    """Largest multiple-of-16 batch tile whose double-buffered blocks fit ~8 MiB."""
    # Per grid step Pallas double-buffers each input:
    #   2 * (f32 logits: 4C + bf16 labels: 2C) = 12C bytes/row, + tiny f32 output.
    bytes_per_row = 12 * C + 8
    budget = 8 * 1024 * 1024          # conservative: safe on v5e/v6e/v7x scoped VMEM
    cap = max(16, min(1024, budget // bytes_per_row))
    cap = (cap // 16) * 16            # bf16 labels need sublane multiple of 16
    b_rounded = ((B + 15) // 16) * 16
    return max(16, min(cap, b_rounded))


def at_loss(logits, labels, *, tile_b=None):
    """Pallas implementation of ATLoss.forward. Returns per-sample loss [B]."""
    B, C = logits.shape
    if tile_b is None:
        tile_b = _pick_tile_b(B, C)
    assert tile_b % 16 == 0, "tile_b must be a multiple of 16 (bf16 sublane tiling)"

    # 0/1 labels are exact in bf16 -> ~33% less HBM read traffic overall.
    labels = labels.astype(jnp.bfloat16)

    # Pad batch to a tile multiple; pad rows produce finite garbage (log C)
    # and are sliced off below (never averaged in).
    Bp = ((B + tile_b - 1) // tile_b) * tile_b
    if Bp != B:
        pad = Bp - B
        logits = jnp.pad(logits, ((0, pad), (0, 0)))
        labels = jnp.pad(labels, ((0, pad), (0, 0)))

    out = pl.pallas_call(
        _atloss_kernel,
        out_shape=jax.ShapeDtypeStruct((Bp, 1), jnp.float32),
        grid_spec=pltpu.PrefetchScalarGridSpec(
            num_scalar_prefetch=0,
            grid=(Bp // tile_b,),
            in_specs=[
                pl.BlockSpec((tile_b, C), lambda i: (i, 0)),   # logits
                pl.BlockSpec((tile_b, C), lambda i: (i, 0)),   # labels (bf16)
            ],
            out_specs=pl.BlockSpec((tile_b, 1), lambda i: (i, 0)),
        ),
        compiler_params=pltpu.CompilerParams(
            # Batch axis is embarrassingly parallel -> megacore sharding on v7x.
            dimension_semantics=(pltpu.PARALLEL,),
            # Explicit headroom; our tiles are budgeted to use well under this
            # and 32 MiB is within physical VMEM on v5e/v6e/v7x.
            vmem_limit_bytes=32 * 1024 * 1024,
        ),
    )(logits, labels)
    return out[:B, 0]


def _at_loss_ref(logits, labels):
    """Pure-JAX reference mirroring the PyTorch forward exactly."""
    th_label = jnp.zeros_like(labels).at[:, 0].set(1.0)
    labels = labels.at[:, 0].set(0.0)
    p_mask = labels + th_label
    n_mask = 1.0 - labels
    logit1 = logits - (1.0 - p_mask) * 1e30
    loss1 = -jnp.sum(jax.nn.log_softmax(logit1, axis=-1) * labels, axis=-1)
    logit2 = logits - (1.0 - n_mask) * 1e30
    loss2 = -jnp.sum(jax.nn.log_softmax(logit2, axis=-1) * th_label, axis=-1)
    return loss1 + loss2


if __name__ == "__main__":
    key = jax.random.PRNGKey(0)
    k1, k2, k3, k4 = jax.random.split(key, 4)

    # Small multi-label setting: 16 samples, 64 classes (col 0 = threshold class).
    B, C = 16, 64
    logits = jax.random.normal(k1, (B, C), dtype=jnp.float32)
    labels = (jax.random.uniform(k2, (B, C)) < 0.1).astype(jnp.float32)

    loss = at_loss(logits, labels)
    jax.block_until_ready(loss)
    ref = _at_loss_ref(logits, labels)
    assert loss.shape == (B,)
    assert jnp.allclose(loss, ref, atol=1e-4, rtol=1e-4)

    # Exercise batch padding + a multi-step grid with a non-aligned batch / odd C.
    B2, C2 = 50, 97
    logits2 = jax.random.normal(k3, (B2, C2), dtype=jnp.float32)
    labels2 = (jax.random.uniform(k4, (B2, C2)) < 0.15).astype(jnp.float32)
    loss2 = at_loss(logits2, labels2, tile_b=16)
    jax.block_until_ready(loss2)
    ref2 = _at_loss_ref(logits2, labels2)
    assert loss2.shape == (B2,)
    assert jnp.allclose(loss2, ref2, atol=1e-4, rtol=1e-4)

    print("KERNEL_OK")
</pallas_src>

<mosaic_0001>
module attributes {stable_mosaic.version = 11 : i64} {
  func.func @_atloss_kernel(%arg0: i32, %arg1: memref<16x64xf32, #tpu.memory_space<vmem>>, %arg2: memref<16x64xbf16, #tpu.memory_space<vmem>>, %arg3: memref<16x1xf32, #tpu.memory_space<vmem>>) attributes {dimension_semantics = [#tpu.dimension_semantics<parallel>], iteration_bounds = array<i64: 1>, scalar_prefetch = 0 : i64, scratch_operands = 0 : i64, tpu.core_type = #tpu.core_type<tc>, window_params = [{transform_indices = @transform_0, window_bounds = array<i64: 16, 64>}, {transform_indices = @transform_1, window_bounds = array<i64: 16, 64>}, {transform_indices = @transform_2, window_bounds = array<i64: 16, 1>}]} {
    %c0 = arith.constant 0 : index
    %c0_0 = arith.constant 0 : index
    %0 = vector.load %arg1[%c0, %c0_0] : memref<16x64xf32, #tpu.memory_space<vmem>>, vector<16x64xf32>
    %c0_1 = arith.constant 0 : index
    %c0_2 = arith.constant 0 : index
    %1 = vector.load %arg2[%c0_1, %c0_2] : memref<16x64xbf16, #tpu.memory_space<vmem>>, vector<16x64xbf16>
    %2 = arith.extf %1 : vector<16x64xbf16> to vector<16x64xf32>
    %3 = tpu.iota {dimensions = array<i32: 1>} : vector<16x64xi32>
    %c0_i32 = arith.constant 0 : i32
    %4 = vector.broadcast %c0_i32 : i32 to vector<16x64xi32>
    %5 = arith.cmpi eq, %3, %4 : vector<16x64xi32>
    %cst = arith.constant 0.000000e+00 : f32
    %6 = vector.broadcast %cst : f32 to vector<16x64xf32>
    %7 = arith.select %5, %6, %2 : vector<16x64xi1>, vector<16x64xf32>
    %cst_3 = arith.constant 1.000000e+00 : f32
    %8 = vector.broadcast %cst_3 : f32 to vector<16x64xf32>
    %9 = arith.select %5, %8, %7 : vector<16x64xi1>, vector<16x64xf32>
    %cst_4 = arith.constant 1.000000e+00 : f32
    %10 = vector.broadcast %cst_4 : f32 to vector<16x64xf32>
    %11 = arith.subf %10, %7 : vector<16x64xf32>
    %cst_5 = arith.constant dense<0xFF800000> : vector<16xf32>
    %12 = vector.multi_reduction <maximumf>, %0, %cst_5 [1] : vector<16x64xf32> to vector<16xf32>
    %13 = vector.shape_cast %12 : vector<16xf32> to vector<16x1xf32>
    %14 = vector.broadcast %13 : vector<16x1xf32> to vector<16x64xf32>
    %15 = arith.subf %0, %14 : vector<16x64xf32>
    %16 = math.exp %15 : vector<16x64xf32>
    %17 = arith.mulf %16, %9 : vector<16x64xf32>
    %cst_6 = arith.constant dense<0.000000e+00> : vector<16xf32>
    %18 = vector.multi_reduction <add>, %17, %cst_6 [1] : vector<16x64xf32> to vector<16xf32>
    %19 = vector.shape_cast %18 : vector<16xf32> to vector<16x1xf32>
    %20 = arith.mulf %16, %11 : vector<16x64xf32>
    %cst_7 = arith.constant dense<0.000000e+00> : vector<16xf32>
    %21 = vector.multi_reduction <add>, %20, %cst_7 [1] : vector<16x64xf32> to vector<16xf32>
    %22 = vector.shape_cast %21 : vector<16xf32> to vector<16x1xf32>
    %23 = math.log %19 : vector<16x1xf32>
    %24 = arith.addf %13, %23 : vector<16x1xf32>
    %25 = math.log %22 : vector<16x1xf32>
    %26 = arith.addf %13, %25 : vector<16x1xf32>
    %cst_8 = arith.constant dense<0.000000e+00> : vector<16xf32>
    %27 = vector.multi_reduction <add>, %7, %cst_8 [1] : vector<16x64xf32> to vector<16xf32>
    %28 = vector.shape_cast %27 : vector<16xf32> to vector<16x1xf32>
    %29 = arith.mulf %9, %0 : vector<16x64xf32>
    %cst_9 = arith.constant dense<0.000000e+00> : vector<16xf32>
    %30 = vector.multi_reduction <add>, %29, %cst_9 [1] : vector<16x64xf32> to vector<16xf32>
    %31 = vector.shape_cast %30 : vector<16xf32> to vector<16x1xf32>
    %32 = arith.mulf %28, %24 : vector<16x1xf32>
    %33 = arith.addf %32, %26 : vector<16x1xf32>
    %34 = arith.subf %33, %31 : vector<16x1xf32>
    %c0_10 = arith.constant 0 : index
    %c0_11 = arith.constant 0 : index
    %35 = vector.load %arg3[%c0_10, %c0_11] : memref<16x1xf32, #tpu.memory_space<vmem>>, vector<16x1xf32>
    tpu.vector_store %arg3[%c0_10, %c0_11], %34 {strides = array<i32>} : memref<16x1xf32, #tpu.memory_space<vmem>>, vector<16x1xf32>,
    return
  }
  func.func @transform_0(%arg0: i32) -> (i32, i32) {
    %c0_i32 = arith.constant 0 : i32
    %c0_i32_0 = arith.constant 0 : i32
    return %arg0, %c0_i32 : i32, i32
  }
  func.func @transform_1(%arg0: i32) -> (i32, i32) {
    %c0_i32 = arith.constant 0 : i32
    %c0_i32_0 = arith.constant 0 : i32
    return %arg0, %c0_i32 : i32, i32
  }
  func.func @transform_2(%arg0: i32) -> (i32, i32) {
    %c0_i32 = arith.constant 0 : i32
    %c0_i32_0 = arith.constant 0 : i32
    return %arg0, %c0_i32 : i32, i32
  }
}

</mosaic_0001>

<bundles_post_ra>
// kernel: tpu_custom_call.1
= control target key start
LH: loop header
LB: loop body
LE: loop exit
PB: predicated region body
PF: predicated region fallthrough
CT: control target
= control target key end

     0   :  { %7 = vsyncpa [#allocation3], 0  ;;  %s260_s0 = inlined_call_operand.hbm [shape: f32[16,64], index: 0, kind: input, shape index: {}]   ;;  %s261_s1 = inlined_call_operand.hbm [shape: bf16[16,64], index: 1, kind: input, shape index: {}]   ;;  %s262_s2 = inlined_call_operand.vmem [shape: f32[16,1], index: 2, kind: output, shape index: {}]  }
   0x1   :  { %8 = vsyncpa [#allocation5], 0  ;;  %s194_s9 = smov [#allocation2]   ;;  %s146_s13 = scalar_lea.hbm %s260_s0, 256 }
   0x2   :  { %s14_s10 = sshll.u32 %s194_s9, 4  ;;  %p147_p0 = scmp.ne.s32.totalorder %s260_s0, %s146_s13  ;;  %s15_s10 = int_to_ptr.vmem [resolvable:$true] %s14_s10 }
   0x3   :  { %p150_p1 = scmp.lt.u32.totalorder %s146_s13, %s260_s0 }
   0x5   :  { %p152_p2 = pnand %p150_p1, %p147_p0 }
   0x7   :  { %155 = shalt.err (!%p152_p2)
}
   0x8   :  { %s156_s18 = scalar_lea.vmem %s15_s10, 256  ;;  %p161_p4 = scmp.lt.s32.totalorder %s15_s10, %s15_s10 }
   0x9   :  { %p157_p3 = scmp.ne.s32.totalorder %s15_s10, %s156_s18  ;;  %p162_p5 = scmp.lt.s32.totalorder %s156_s18, %s156_s18 }
   0xb   :  { %p163_p6 = por %p162_p5, %p161_p4 }
   0xd   :  { %p164_p7 = pnand %p163_p6, %p157_p3 }
   0xf   :  { %167 = shalt.err (!%p164_p7)
}
  0x10   :  { %s195_s19 = smov 128   ;;  %s196_s20 = smov 8  }
  0x11   :  { %20 = dma.hbm_to_vmem [thread:$0]  %s260_s0, 256, %s15_s10, [#allocation3], %s195_s19, %s195_s19, %s196_s20  }
  0x12   :  { %s197_s23 = smov [#allocation4]   ;;  %s168_s27 = scalar_lea.hbm %s261_s1, 128 }
  0x13   :  { %s26_s24 = sshll.u32 %s197_s23, 4  ;;  %p169_p8 = scmp.ne.s32.totalorder %s261_s1, %s168_s27  ;;  %s27_s24 = int_to_ptr.vmem [resolvable:$true] %s26_s24 }
  0x14   :  { %p172_p9 = scmp.lt.u32.totalorder %s168_s27, %s261_s1 }
  0x16   :  { %p174_p10 = pnand %p172_p9, %p169_p8 }
  0x18   :  { %177 = shalt.err (!%p174_p10)
}
  0x19   :  { %s178_s4 = scalar_lea.vmem %s27_s24, 128  ;;  %p183_p12 = scmp.lt.s32.totalorder %s27_s24, %s27_s24 }
  0x1a   :  { %p179_p11 = scmp.ne.s32.totalorder %s27_s24, %s178_s4  ;;  %p184_p13 = scmp.lt.s32.totalorder %s178_s4, %s178_s4 }
  0x1c   :  { %p185_p0 = por %p184_p13, %p183_p12 }
  0x1e   :  { %p186_p1 = pnand %p185_p0, %p179_p11 }
  0x20   :  { %189 = shalt.err (!%p186_p1)
}
  0x21   :  { %s198_s0 = smov 64   ;;  %s199_s5 = smov 4  }
  0x22   :  { %32 = dma.hbm_to_vmem [thread:$0]  %s261_s1, 128, %s27_s24, [#allocation5], %s198_s0, %s198_s0, %s199_s5  }
  0x23   :  { %190 = dma.done.wait [#allocation3], 256  }
  0x24   :  { %191 = vsyncadd [#allocation3], 4294967040 }
  0x25   :  { %192 = dma.done.wait [#allocation5], 128  }
  0x26   :  { %193 = vsyncadd [#allocation5], 4294967168  ;;  %vm54_vm0 = vcmask 523264   ;;  %v39_v0 = vld [vmem:[#allocation2] sm:$0xff]  ;;  %v40_v1 = vld [vmem:[#allocation2 + $0x8] sm:$0xff]  ;;  %v45_v4 = vlaneseq  ;;  %vm115_vm2 = vcmask 7168  }
  0x27   :  { %v55_v2 = vsel %vm54_vm0, %v39_v0, -inf  ;;  %v58_v3 = vsel %vm54_vm0, %v40_v1, -inf  ;;  %v125_v7 = vld [vmem:[#allocation4] sm:$0xff]  }
  0x28   :  { %56 = vmax.xlane.f32.xlu0 %v55_v2  ;;  %v46_v8 = vand.u32 127, %v45_v4  ;;  %v126_v12 = vunpack.c.l.bf16 %v125_v7  ;;  %v127_v15 = vunpack.c.h.bf16 %v125_v7 }
  0x2a   :  { %vm47_vm1 = vcmp.eq.s32.totalorder %v46_v8, 0 }
  0x2b   :  { %v48_v14 = vsel %vm47_vm1, 0.0, %v126_v12  ;;  %v50_v17 = vsel %vm47_vm1, 1.0, %v126_v12  ;;  %v49_v19 = vsel %vm47_vm1, 0.0, %v127_v15  ;;  %v51_v22 = vsel %vm47_vm1, 1.0, %v127_v15 }
  0x2c   :  { %59 = vmax.xlane.f32.xlu0 %v58_v3  ;;  %v52_v16 = vsub.f32 1.0, %v48_v14  ;;  %v53_v25 = vsub.f32 1.0, %v49_v19  ;;  %v95_v28 = vsel %vm54_vm0, %v48_v14, 0.0  ;;  %v101_v29 = vmul.f32 %v50_v17, %v39_v0 }
  0x2d   :  { %v98_v34 = vsel %vm54_vm0, %v49_v19, 0.0  ;;  %v102_v35 = vmul.f32 %v51_v22, %v40_v1 }
  0x2e   :  { %v103_v32 = vsel %vm54_vm0, %v101_v29, 0.0 }
  0x2f   :  { %v106_v36 = vsel %vm54_vm0, %v102_v35, 0.0 }
  0xb5   :  { %v57_v5 = vpop.xlane.xlu0 %56 }
  0xb6   :  { %v61_v6 = vsub.f32 %v39_v0, %v57_v5 }
  0xb8   :  { %v63_v9 = vmul.f32 1.442695, %v61_v6 }
  0xb9   :  { %v241_v10 = vpop.xlane.xlu0 %59 }
  0xba   :  { %134 = vpow2.f32 %v63_v9  ;;  %v62_v11 = vsub.f32 %v40_v1, %v241_v10 }
  0xbc   :  { %v65_v13 = vmul.f32 1.442695, %v62_v11 }
  0xbe   :  { %136 = vpow2.f32 %v65_v13 }
  0xc4   :  { %v135_v18 = vpop.eup %134 }
  0xc5   :  { %v75_v20 = vmul.f32 %v135_v18, %v52_v16  ;;  %v67_v21 = vmul.f32 %v135_v18, %v50_v17 }
  0xc7   :  { %v77_v23 = vsel %vm54_vm0, %v75_v20, 0.0  ;;  %v69_v24 = vsel %vm54_vm0, %v67_v21, 0.0 }
  0xc8   :  { %v137_v26 = vpop.eup %136  ;;  %78 = vadd.xlane.f32.xlu0 %v77_v23  ;;  %70 = vadd.xlane.f32.xlu1 %v69_v24 }
  0xc9   :  { %v68_v27 = vmul.f32 %v137_v26, %v51_v22  ;;  %v76_v31 = vmul.f32 %v137_v26, %v53_v25 }
  0xcb   :  { %v72_v30 = vsel %vm54_vm0, %v68_v27, 0.0  ;;  %v80_v33 = vsel %vm54_vm0, %v76_v31, 0.0 }
  0xcc   :  { %73 = vadd.xlane.f32.xlu1 %v72_v30  ;;  %96 = vadd.xlane.f32.xlu0 %v95_v28 }
  0xd0   :  { %81 = vadd.xlane.f32.xlu1 %v80_v33  ;;  %104 = vadd.xlane.f32.xlu0 %v103_v32 }
  0xd4   :  { %99 = vadd.xlane.f32.xlu1 %v98_v34 }
  0xd8   :  { %107 = vadd.xlane.f32.xlu1 %v106_v36 }
 0x155   :  { %v71_v37 = vpop.xlane.xlu1 %70  ;;  %v79_v38 = vpop.xlane.xlu0 %78 }
 0x156   :  { %138 = vlog2.f32 %v71_v37 }
 0x157   :  { %140 = vlog2.f32 %v79_v38 }
 0x159   :  { %v74_v39 = vpop.xlane.xlu1 %73  ;;  %v97_v42 = vpop.xlane.xlu0 %96 }
 0x15a   :  { %142 = vlog2.f32 %v74_v39 }
 0x15d   :  { %v82_v40 = vpop.xlane.xlu1 %81  ;;  %v105_v51 = vpop.xlane.xlu0 %104 }
 0x15e   :  { %144 = vlog2.f32 %v82_v40 }
 0x160   :  { %v139_v41 = vpop.eup %138 }
 0x161   :  { %v141_v43 = vpop.eup %140  ;;  %v84_v44 = vmul.f32 0.6931472, %v139_v41  ;;  %v100_v55 = vpop.xlane.xlu1 %99 }
 0x162   :  { %v90_v45 = vmul.f32 0.6931472, %v141_v43 }
 0x163   :  { %v87_v46 = vadd.f32 %v84_v44, %v57_v5 }
 0x164   :  { %v143_v47 = vpop.eup %142  ;;  %v93_v50 = vadd.f32 %v90_v45, %v57_v5 }
 0x165   :  { %v86_v48 = vmul.f32 0.6931472, %v143_v47  ;;  %v109_v49 = vmul.f32 %v97_v42, %v87_v46  ;;  %v108_v60 = vpop.xlane.xlu1 %107 }
 0x167   :  { %v88_v52 = vadd.f32 %v86_v48, %v241_v10  ;;  %v111_v53 = vadd.f32 %v109_v49, %v93_v50 }
 0x168   :  { %v145_v54 = vpop.eup %144 }
 0x169   :  { %v92_v56 = vmul.f32 0.6931472, %v145_v54  ;;  %v113_v57 = vsub.f32 %v111_v53, %v105_v51  ;;  %v110_v58 = vmul.f32 %v100_v55, %v88_v52 }
 0x16b   :  { %116 = vst.msk [vmem:[%s262_s2] sm:$0xff] %vm115_vm2, %v113_v57  ;;  %v94_v59 = vadd.f32 %v92_v56, %v241_v10 }
 0x16d   :  { %v112_v61 = vadd.f32 %v110_v58, %v94_v59 }
 0x16f   :  { %v114_v62 = vsub.f32 %v112_v61, %v108_v60 }
 0x171   :  { %117 = vst.msk [vmem:[%s262_s2 + $0x8] sm:$0xff] %vm115_vm2, %v114_v62 }
 0x172   :  { %122 = vsyncpa [#allocation3], 1 }
 0x173   :  { %123 = vsyncpa [#allocation5], 1 }

</bundles_post_ra>
